<compile_context>
chip_gen: v5e
topology: v5e:2x2
jax: 0.10.0
libtpu: 0.0.40
codegen_flags: <defaults>
</compile_context>

<pallas_src>
import jax
import jax.numpy as jnp
from jax.experimental import pallas as pl
from jax.experimental.pallas import tpu as pltpu

LANES = 128


def mlp_kernel(params_ref, x_ref, o_ref):
    # params_ref : SMEM f32[13] = [ w1 row-major (6) | b1 (3) | w2 (3) | b2 (1) ]
    # x_ref      : VMEM (2, TILE_R, 128)  -- feature-major, batch dense on
    #                                        sublanes (TILE_R) and lanes (128)
    # o_ref      : VMEM (TILE_R, 128)     -- lane-dense output tile
    w = params_ref
    x0 = x_ref[0, :, :]          # (TILE_R, 128)
    x1 = x_ref[1, :, :]          # (TILE_R, 128)

    # y = relu(x @ W1 + b1) @ W2 + b2, fully unrolled as VPU broadcast-FMAs.
    acc = jnp.zeros_like(x0)
    for j in range(3):
        # hidden unit j:  w1[0,j]*x0 + w1[1,j]*x1 + b1[j], then ReLU
        hj = jnp.maximum(w[j] * x0 + w[3 + j] * x1 + w[6 + j], 0.0)
        acc = acc + w[9 + j] * hj              # * w2[j, 0]
    o_ref[...] = (acc + w[12]).astype(o_ref.dtype)   # + b2


def mlp_forward(x, w1, b1, w2, b2, *, target_tile_rows=8192, min_grid_steps=4):
    """x: (B, 2).  Weights stored (in, out): w1 (2,3), b1 (3,), w2 (3,1), b2 (1,)."""
    x = jnp.asarray(x, jnp.float32)
    B = x.shape[0]
    if B == 0:
        return jnp.zeros((0, 1), jnp.float32)

    # --- batch tiling: rows of 128 lanes, dense on both vreg axes -------------
    r_total = pl.cdiv(B, LANES)                               # rows of 128 elems
    # Big enough to amortize per-step overhead, small enough to keep
    # >= min_grid_steps grid steps and bound padding waste; multiple of 8
    # to satisfy the (8, 128) sublane tiling.
    tile_r = min(target_tile_rows, pl.cdiv(r_total, min_grid_steps))
    tile_r = max(8, pl.cdiv(tile_r, 8) * 8)
    r_pad = pl.cdiv(r_total, tile_r) * tile_r
    b_pad = r_pad * LANES

    # (B,2) -> zero-pad batch -> feature-major (2, B_pad) -> free view
    # (2, R_pad, 128).  Padded lanes only see mul/add/ReLU (no NaN risk) and are
    # sliced off below.
    # TODO(synk): the pad+transpose is one extra XLA read+write of x; an
    # in-kernel even/odd-lane deinterleave (pltpu.roll + select on an (R, 256)
    # view) could remove it at the cost of a lane-compaction on the output.
    xt = jnp.pad(x, ((0, b_pad - B), (0, 0))).T.reshape(2, r_pad, LANES)

    # Pack all 13 parameter scalars into one flat SMEM-resident array.
    params = jnp.concatenate(
        [jnp.asarray(w1, jnp.float32).reshape(-1),
         jnp.asarray(b1, jnp.float32).reshape(-1),
         jnp.asarray(w2, jnp.float32).reshape(-1),
         jnp.asarray(b2, jnp.float32).reshape(-1)]
    )                                                          # (13,)

    grid = (r_pad // tile_r,)

    # Double-buffered VMEM footprint: 2 x input block + 2 x output block (+ slack).
    in_block_bytes = 2 * tile_r * LANES * 4
    out_block_bytes = tile_r * LANES * 4
    vmem_need = 2 * in_block_bytes + 2 * out_block_bytes + (2 << 20)
    vmem_limit = int(min(max(vmem_need, 16 << 20), 48 << 20))  # safe on v5e/v6e/v7x

    out = pl.pallas_call(
        mlp_kernel,
        out_shape=jax.ShapeDtypeStruct((r_pad, LANES), jnp.float32),
        grid=grid,
        in_specs=[
            pl.BlockSpec(memory_space=pltpu.MemorySpace.SMEM),     # 13 scalars
            pl.BlockSpec((2, tile_r, LANES), lambda i: (0, i, 0)), # x tile
        ],
        out_specs=pl.BlockSpec((tile_r, LANES), lambda i: (i, 0)), # lane-dense out
        compiler_params=pltpu.CompilerParams(
            dimension_semantics=("parallel",),     # shard batch across TCs (v7x)
            vmem_limit_bytes=vmem_limit,
        ),
    )(params, xt)

    # (R_pad, 128) -> (B_pad,) is a free row-major view; slice off the padded
    # tail and restore the PyTorch-style (B, 1) shape.
    return out.reshape(b_pad)[:B].reshape(B, 1)


def init_params(key):
    """Deterministic init mimicking nn.Linear's U(-1/sqrt(fan_in), 1/sqrt(fan_in))."""
    k1, k2, k3, k4 = jax.random.split(key, 4)
    bound1 = 1.0 / jnp.sqrt(2.0)   # fan_in = 2
    bound2 = 1.0 / jnp.sqrt(3.0)   # fan_in = 3
    w1 = jax.random.uniform(k1, (2, 3), jnp.float32, -bound1, bound1)
    b1 = jax.random.uniform(k2, (3,), jnp.float32, -bound1, bound1)
    w2 = jax.random.uniform(k3, (3, 1), jnp.float32, -bound2, bound2)
    b2 = jax.random.uniform(k4, (1,), jnp.float32, -bound2, bound2)
    return w1, b1, w2, b2


if __name__ == "__main__":
    key = jax.random.PRNGKey(0)
    xkey, pkey = jax.random.split(key)

    B = 8
    x = jax.random.normal(xkey, (B, 2), dtype=jnp.float32)
    w1, b1, w2, b2 = init_params(pkey)

    out = mlp_forward(x, w1, b1, w2, b2)
    jax.block_until_ready(out)

    # Pure-JAX reference of the same forward pass (weights stored as (in, out)).
    ref = jnp.maximum(x @ w1 + b1, 0.0) @ w2 + b2
    assert out.shape == (B, 1)
    assert jnp.allclose(out, ref, atol=1e-5, rtol=1e-5)

    print("KERNEL_OK")
</pallas_src>

<mosaic_0001>
module attributes {stable_mosaic.version = 11 : i64} {
  func.func @mlp_kernel(%arg0: i32, %arg1: memref<13xf32, #tpu.memory_space<smem>>, %arg2: memref<2x8x128xf32, #tpu.memory_space<vmem>>, %arg3: memref<8x128xf32, #tpu.memory_space<vmem>>) attributes {dimension_semantics = [#tpu.dimension_semantics<parallel>], iteration_bounds = array<i64: 1>, scalar_prefetch = 0 : i64, scratch_operands = 0 : i64, tpu.core_type = #tpu.core_type<tc>, window_params = [{transform_indices = @transform_0, window_bounds = array<i64: 13>}, {transform_indices = @transform_1, window_bounds = array<i64: 2, 8, 128>}, {transform_indices = @transform_2, window_bounds = array<i64: 8, 128>}]} {
    %c0 = arith.constant 0 : index
    %c0_0 = arith.constant 0 : index
    %c0_1 = arith.constant 0 : index
    %0 = vector.load %arg2[%c0, %c0_0, %c0_1] : memref<2x8x128xf32, #tpu.memory_space<vmem>>, vector<1x8x128xf32>
    %1 = vector.shape_cast %0 : vector<1x8x128xf32> to vector<8x128xf32>
    %c1 = arith.constant 1 : index
    %c0_2 = arith.constant 0 : index
    %c0_3 = arith.constant 0 : index
    %2 = vector.load %arg2[%c1, %c0_2, %c0_3] : memref<2x8x128xf32, #tpu.memory_space<vmem>>, vector<1x8x128xf32>
    %3 = vector.shape_cast %2 : vector<1x8x128xf32> to vector<8x128xf32>
    %cst = arith.constant 0.000000e+00 : f32
    %4 = vector.broadcast %cst : f32 to vector<8x128xf32>
    %c0_4 = arith.constant 0 : index
    %5 = memref.load %arg1[%c0_4] : memref<13xf32, #tpu.memory_space<smem>>
    %6 = vector.broadcast %5 : f32 to vector<8x128xf32>
    %7 = arith.mulf %6, %1 : vector<8x128xf32>
    %c3 = arith.constant 3 : index
    %8 = memref.load %arg1[%c3] : memref<13xf32, #tpu.memory_space<smem>>
    %9 = vector.broadcast %8 : f32 to vector<8x128xf32>
    %10 = arith.mulf %9, %3 : vector<8x128xf32>
    %11 = arith.addf %7, %10 : vector<8x128xf32>
    %c6 = arith.constant 6 : index
    %12 = memref.load %arg1[%c6] : memref<13xf32, #tpu.memory_space<smem>>
    %13 = vector.broadcast %12 : f32 to vector<8x128xf32>
    %14 = arith.addf %11, %13 : vector<8x128xf32>
    %cst_5 = arith.constant 0.000000e+00 : f32
    %15 = vector.broadcast %cst_5 : f32 to vector<8x128xf32>
    %16 = arith.maximumf %14, %15 : vector<8x128xf32>
    %c9 = arith.constant 9 : index
    %17 = memref.load %arg1[%c9] : memref<13xf32, #tpu.memory_space<smem>>
    %18 = vector.broadcast %17 : f32 to vector<8x128xf32>
    %19 = arith.mulf %18, %16 : vector<8x128xf32>
    %20 = arith.addf %4, %19 : vector<8x128xf32>
    %c1_6 = arith.constant 1 : index
    %21 = memref.load %arg1[%c1_6] : memref<13xf32, #tpu.memory_space<smem>>
    %22 = vector.broadcast %21 : f32 to vector<8x128xf32>
    %23 = arith.mulf %22, %1 : vector<8x128xf32>
    %c4 = arith.constant 4 : index
    %24 = memref.load %arg1[%c4] : memref<13xf32, #tpu.memory_space<smem>>
    %25 = vector.broadcast %24 : f32 to vector<8x128xf32>
    %26 = arith.mulf %25, %3 : vector<8x128xf32>
    %27 = arith.addf %23, %26 : vector<8x128xf32>
    %c7 = arith.constant 7 : index
    %28 = memref.load %arg1[%c7] : memref<13xf32, #tpu.memory_space<smem>>
    %29 = vector.broadcast %28 : f32 to vector<8x128xf32>
    %30 = arith.addf %27, %29 : vector<8x128xf32>
    %cst_7 = arith.constant 0.000000e+00 : f32
    %31 = vector.broadcast %cst_7 : f32 to vector<8x128xf32>
    %32 = arith.maximumf %30, %31 : vector<8x128xf32>
    %c10 = arith.constant 10 : index
    %33 = memref.load %arg1[%c10] : memref<13xf32, #tpu.memory_space<smem>>
    %34 = vector.broadcast %33 : f32 to vector<8x128xf32>
    %35 = arith.mulf %34, %32 : vector<8x128xf32>
    %36 = arith.addf %20, %35 : vector<8x128xf32>
    %c2 = arith.constant 2 : index
    %37 = memref.load %arg1[%c2] : memref<13xf32, #tpu.memory_space<smem>>
    %38 = vector.broadcast %37 : f32 to vector<8x128xf32>
    %39 = arith.mulf %38, %1 : vector<8x128xf32>
    %c5 = arith.constant 5 : index
    %40 = memref.load %arg1[%c5] : memref<13xf32, #tpu.memory_space<smem>>
    %41 = vector.broadcast %40 : f32 to vector<8x128xf32>
    %42 = arith.mulf %41, %3 : vector<8x128xf32>
    %43 = arith.addf %39, %42 : vector<8x128xf32>
    %c8 = arith.constant 8 : index
    %44 = memref.load %arg1[%c8] : memref<13xf32, #tpu.memory_space<smem>>
    %45 = vector.broadcast %44 : f32 to vector<8x128xf32>
    %46 = arith.addf %43, %45 : vector<8x128xf32>
    %cst_8 = arith.constant 0.000000e+00 : f32
    %47 = vector.broadcast %cst_8 : f32 to vector<8x128xf32>
    %48 = arith.maximumf %46, %47 : vector<8x128xf32>
    %c11 = arith.constant 11 : index
    %49 = memref.load %arg1[%c11] : memref<13xf32, #tpu.memory_space<smem>>
    %50 = vector.broadcast %49 : f32 to vector<8x128xf32>
    %51 = arith.mulf %50, %48 : vector<8x128xf32>
    %52 = arith.addf %36, %51 : vector<8x128xf32>
    %c12 = arith.constant 12 : index
    %53 = memref.load %arg1[%c12] : memref<13xf32, #tpu.memory_space<smem>>
    %54 = vector.broadcast %53 : f32 to vector<8x128xf32>
    %55 = arith.addf %52, %54 : vector<8x128xf32>
    %c0_9 = arith.constant 0 : index
    %c0_10 = arith.constant 0 : index
    %56 = vector.load %arg3[%c0_9, %c0_10] : memref<8x128xf32, #tpu.memory_space<vmem>>, vector<8x128xf32>
    tpu.vector_store %arg3[%c0_9, %c0_10], %55 {strides = array<i32>} : memref<8x128xf32, #tpu.memory_space<vmem>>, vector<8x128xf32>,
    return
  }
  func.func @transform_0(%arg0: i32) -> i32 {
    %c0_i32 = arith.constant 0 : i32
    %c0_i32_0 = arith.constant 0 : i32
    return %c0_i32 : i32
  }
  func.func @transform_1(%arg0: i32) -> (i32, i32, i32) {
    %c0_i32 = arith.constant 0 : i32
    %c0_i32_0 = arith.constant 0 : i32
    %c0_i32_1 = arith.constant 0 : i32
    return %c0_i32, %arg0, %c0_i32_0 : i32, i32, i32
  }
  func.func @transform_2(%arg0: i32) -> (i32, i32) {
    %c0_i32 = arith.constant 0 : i32
    %c0_i32_0 = arith.constant 0 : i32
    return %arg0, %c0_i32 : i32, i32
  }
}

</mosaic_0001>

<bundles_post_ra>
// kernel: tpu_custom_call.1
= control target key start
LH: loop header
LB: loop body
LE: loop exit
PB: predicated region body
PF: predicated region fallthrough
CT: control target
= control target key end

     0   :  { %7 = vsyncpa [#allocation5], 0  ;;  %s226_s0 = inlined_call_operand.hbm [shape: f32[13], index: 0, kind: input, shape index: {}]   ;;  %s227_s1 = inlined_call_operand.hbm [shape: f32[2,8,128], index: 1, kind: input, shape index: {}]   ;;  %s228_s2 = inlined_call_operand.hbm [shape: f32[8,128], index: 2, kind: output, shape index: {}]  }
   0x1   :  { %8 = vsyncpa [#allocation3], 0 }
   0x2   :  { %9 = vsyncpa [#allocation4], 0  ;;  %s15_s11 = sshll.u32 %s226_s0, 4  ;;  %s23_s14 = sshll.u32 %s227_s1, 4  ;;  %s16_s11 = int_to_ptr.hbm [resolvable:$true] %s15_s11  ;;  %s24_s14 = int_to_ptr.hbm [resolvable:$true] %s23_s14 }
   0x3   :  { %s194_s15 = smov [#allocation2]   ;;  %s195_s16 = smov [#allocation6]  }
   0x4   :  { %18 = dma.hbm_to_smem %s16_s11, 16, %s194_s15, [#allocation5]  }
   0x5   :  { %s25_s17 = sshll.u32 %s195_s16, 4  ;;  %s196_s18 = smov 128   ;;  %s26_s17 = int_to_ptr.vmem [resolvable:$true] %s25_s17 }
   0x6   :  { %s197_s19 = smov 8  }
   0x7   :  { %31 = dma.hbm_to_vmem [thread:$0]  %s24_s14, 256, %s26_s17, [#allocation3], %s196_s18, %s196_s18, %s197_s19  }
   0x8   :  { %188 = dma.done.wait [#allocation5], 16  }
   0x9   :  { %189 = vsyncadd [#allocation5], 4294967280 }
   0xa   :  { %190 = dma.done.wait [#allocation3], 256  }
   0xb   :  { %191 = vsyncadd [#allocation3], 4294967040 }
   0xc   :  { %40 = sfence }
   0xd   :  { %s44_s0 = sld [smem:[#allocation2]]  ;;  %v41_v0 = vld [vmem:[#allocation6] sm:$0xff]  ;;  %v43_v1 = vld [vmem:[#allocation6 + $0x8] sm:$0xff]  ;;  %s198_s3 = smov [#allocation7]  }
   0xe   :  { %s111_s20 = sld [smem:[#allocation2 + $0x3]]  ;;  %s98_s4 = sshll.u32 %s198_s3, 4  ;;  %s99_s4 = int_to_ptr.vmem [resolvable:$true] %s98_s4 }
   0xf   :  { %s112_s21 = sld [smem:[#allocation2 + $0x6]]  ;;  %s100_s7 = sshll.u32 %s228_s2, 4  ;;  %s101_s7 = int_to_ptr.hbm [resolvable:$true] %s100_s7 }
  0x10   :  { %s220_s22 = sld [smem:[#allocation2 + $0x9]] }
  0x11   :  { %s114_s1 = sld [smem:[#allocation2 + $0x1]] }
  0x12   :  { %s115_s23 = sld [smem:[#allocation2 + $0x4]] }
  0x13   :  { %v45_v2 = vstv %s44_s0  ;;  %s116_s24 = sld [smem:[#allocation2 + $0x7]] }
  0x14   :  { %v46_v3 = vmul.f32 %v45_v2, %v41_v0  ;;  %v48_v4 = vstv %s111_s20  ;;  %s117_s25 = sld [smem:[#allocation2 + $0xa]] }
  0x15   :  { %v49_v5 = vmul.f32 %v48_v4, %v43_v1  ;;  %s118_s26 = sld [smem:[#allocation2 + $0x2]]  ;;  %v52_v6 = vstv %s112_s21 }
  0x16   :  { %s119_s27 = sld [smem:[#allocation2 + $0x5]]  ;;  %v56_v17 = vstv %s220_s22 }
  0x17   :  { %v50_v7 = vadd.f32 %v49_v5, %v46_v3  ;;  %v60_v8 = vstv %s114_s1  ;;  %s120_s28 = sld [smem:[#allocation2 + $0x8]] }
  0x18   :  { %v61_v9 = vmul.f32 %v60_v8, %v41_v0  ;;  %v63_v10 = vstv %s115_s23  ;;  %s121_s29 = sld [smem:[#allocation2 + $0xb]] }
  0x19   :  { %v53_v11 = vadd.f32 %v52_v6, %v50_v7  ;;  %v64_v12 = vmul.f32 %v63_v10, %v43_v1  ;;  %v67_v13 = vstv %s116_s24  ;;  %s122_s30 = sld [smem:[#allocation2 + $0xc]] }
  0x1a   :  { %v71_v22 = vstv %s117_s25 }
  0x1b   :  { %v54_v14 = vmax.f32 %v53_v11, 0.0  ;;  %v65_v15 = vadd.f32 %v64_v12, %v61_v9  ;;  %v75_v16 = vstv %s118_s26 }
  0x1c   :  { %v76_v18 = vmul.f32 %v75_v16, %v41_v0  ;;  %v78_v19 = vstv %s119_s27 }
  0x1d   :  { %v68_v20 = vadd.f32 %v67_v13, %v65_v15  ;;  %v79_v21 = vmul.f32 %v78_v19, %v43_v1  ;;  %v82_v23 = vstv %s120_s28  ;;  %v57_v24 = vmul.f32 %v56_v17, %v54_v14 }
  0x1e   :  { %v86_v29 = vstv %s121_s29 }
  0x1f   :  { %v69_v25 = vmax.f32 %v68_v20, 0.0  ;;  %v80_v26 = vadd.f32 %v79_v21, %v76_v18  ;;  %v90_v33 = vstv %s122_s30 }
  0x21   :  { %v72_v27 = vmul.f32 %v71_v22, %v69_v25  ;;  %v83_v28 = vadd.f32 %v82_v23, %v80_v26 }
  0x23   :  { %v73_v30 = vadd.f32 %v72_v27, %v57_v24  ;;  %v84_v31 = vmax.f32 %v83_v28, 0.0 }
  0x25   :  { %v87_v32 = vmul.f32 %v86_v29, %v84_v31 }
  0x27   :  { %v88_v34 = vadd.f32 %v87_v32, %v73_v30 }
  0x29   :  { %v91_v35 = vadd.f32 %v90_v33, %v88_v34 }
  0x2b   :  { %92 = vst [vmem:[#allocation7] sm:$0xff] %v91_v35 }
  0x2c   :  { %103 = dma.vmem_to_hbm [thread:$0]  %s99_s4, 128, %s101_s7, [#allocation4]  }
  0x2d   :  { %192 = dma.done.wait [#allocation4], 128  }
  0x2e   :  { %193 = vsyncadd [#allocation4], 4294967168 }
  0x2f   :  { %108 = vsyncpa [#allocation3], 1 }
  0x30   :  { %109 = vsyncpa [#allocation4], 1 }
  0x31   :  { %110 = vsyncpa [#allocation5], 1 }

</bundles_post_ra>
